<compile_context>
chip_gen: v6e
topology: v6e:2x2x1
jax: 0.10.0
libtpu: 0.0.40
codegen_flags: <defaults>
</compile_context>

<pallas_src>
import functools
import numpy as np
import jax
import jax.numpy as jnp
from jax.experimental import pallas as pl
from jax.experimental.pallas import tpu as pltpu


def _round_up(x, m):
    return ((x + m - 1) // m) * m


_NEG = -1e30  # finite "-inf": avoids inf-inf NaNs in the online updates


def _clip_loss_kernel(scale_ref, labels_ref, cls_ref, a_ref, b_ref,
                      rowlse_ref, diag_ref, clsnll_ref, colpart_ref, colref_ref,
                      anorm_sc, m_sc, l_sc, *, valid_b):
    i = pl.program_id(0)          # row block  ("parallel")
    j = pl.program_id(1)          # col block  ("arbitrary" / reduction)
    TM, D = a_ref.shape
    TN = b_ref.shape[0]
    C = cls_ref.shape[1]

    row_ids = i * TM + jax.lax.broadcasted_iota(jnp.int32, (TM, 1), 0)     # (TM, 1)
    row_valid = row_ids < valid_b

    # ----------------- once per row block (first column step) -----------------
    @pl.when(j == 0)
    def _():
        # L2-normalize the row features, fold exp(logit_scale) in (O(TM*D), not
        # O(TM*TN)), cache in VMEM scratch in the MXU dtype.
        a = a_ref[...].astype(jnp.float32)
        scale = jnp.exp(scale_ref[0, 0])
        inv_a = jax.lax.rsqrt(jnp.maximum(jnp.sum(a * a, axis=-1, keepdims=True),
                                          1e-24))
        anorm_sc[...] = (a * (scale * inv_a)).astype(anorm_sc.dtype)
        m_sc[...] = jnp.full_like(m_sc, _NEG)
        l_sc[...] = jnp.zeros_like(l_sc)
        diag_ref[...] = jnp.zeros_like(diag_ref)

        # Classification cross-entropy for this row block (whole C at once).
        # TODO(synk): tile over C with an online max/sum for very large heads.
        x = cls_ref[...].astype(jnp.float32)                                # (TM, C)
        xm = jnp.max(x, axis=-1, keepdims=True)
        lse_cls = xm + jnp.log(jnp.sum(jnp.exp(x - xm), axis=-1, keepdims=True))
        cls_cols = jax.lax.broadcasted_iota(jnp.int32, (TM, C), 1)
        picked = jnp.sum(jnp.where(cls_cols == labels_ref[...], x, 0.0),
                         axis=-1, keepdims=True)
        clsnll_ref[...] = lse_cls - picked

    # ----------------------------- contrastive tile ---------------------------
    b = b_ref[...].astype(jnp.float32)
    inv_b = jax.lax.rsqrt(jnp.maximum(jnp.sum(b * b, axis=-1, keepdims=True), 1e-24))
    bm = (b * inv_b).astype(anorm_sc.dtype)

    sim = jax.lax.dot_general(anorm_sc[...], bm,                            # (TM, TN)
                              dimension_numbers=(((1,), (1,)), ((), ())),
                              preferred_element_type=jnp.float32)

    col_ids = j * TN + jax.lax.broadcasted_iota(jnp.int32, (TM, TN), 1)
    col_valid = col_ids < valid_b
    sim = jnp.where(col_valid, sim, _NEG)        # padded columns drop out of softmax

    # Diagonal of the global (B,B) matrix lives only in blocks j == i (TM == TN).
    @pl.when(j == i)
    def _():
        on_diag = (col_ids == row_ids) & col_valid
        diag_ref[...] = jnp.sum(jnp.where(on_diag, sim, 0.0), axis=-1, keepdims=True)

    # Online row logsumexp.  `e` is the ONLY O(B^2) exp in the kernel and is
    # shared with the column partial sums below (halves the EUP load).
    m_old = m_sc[...]
    m_new = jnp.maximum(m_old, jnp.max(sim, axis=-1, keepdims=True))
    e = jnp.exp(sim - m_new)                                                # (TM, TN)
    l_new = jnp.exp(m_old - m_new) * l_sc[...] + jnp.sum(e, axis=-1, keepdims=True)
    m_sc[...] = m_new
    l_sc[...] = l_new
    rowlse_ref[...] = m_new + jnp.log(l_new)     # final value correct at last j

    # Column partials: sum_r exp(sim[r, c] - t) with a per-(row-block, col-block)
    # reference t = max_r m_new[r].  Exact; the only caveat is f32 underflow when
    # 2 * exp(logit_scale) > ~85, which cannot happen at CLIP's usual scales.
    t = jnp.max(jnp.where(row_valid, m_new, _NEG))                          # scalar
    w = jnp.where(row_valid, jnp.exp(m_new - t), 0.0)                       # (TM, 1)
    cp = jnp.sum(e * w, axis=0)                                             # (TN,)
    colpart_ref[...] = jnp.broadcast_to(cp, colpart_ref.shape)
    colref_ref[...] = jnp.full(colref_ref.shape, t, jnp.float32)


def clip_loss(logits_cls, labels_cls, logits_cont, logits_cont_gen, logit_scale,
              *, beta=1.0, mxu_dtype=jnp.bfloat16, block=256, col_buffers=3):
    """Returns dict with 'loss', 'loss_cls', 'loss_cont' (float32 scalars)."""
    B, C = logits_cls.shape
    D = logits_cont.shape[-1]

    block = max(128, _round_up(block, 128))
    TM = TN = _round_up(B, 8) if B <= block else block      # TM == TN (diag blocks)
    B_pad = _round_up(B, TM)
    D_pad = _round_up(D, 128)                                # lane-aligned contraction
    nR = B_pad // TM
    nC = B_pad // TN

    def _pad(x, rows, cols=None):
        pads = [(0, rows - x.shape[0]), (0, 0)]
        if cols is not None:
            pads[1] = (0, cols - x.shape[1])
        return jnp.pad(x, pads)

    # Pads only -- inputs keep their native HBM dtype (no wrapper-side up-casts).
    cls_p = _pad(logits_cls, B_pad)
    a_p = _pad(logits_cont, B_pad, D_pad)
    b_p = _pad(logits_cont_gen, B_pad, D_pad)
    labels_p = _pad(labels_cls.astype(jnp.int32).reshape(B, 1), B_pad)
    scale_2d = jnp.asarray(logit_scale, jnp.float32).reshape(1, 1)

    def _b_spec():
        # Streamed GEN blocks; deeper buffering only pays off with many col steps.
        if nC >= 3 and hasattr(pl, "Buffered"):
            try:
                return pl.BlockSpec((TN, D_pad), lambda i, j: (j, 0),
                                    pipeline_mode=pl.Buffered(col_buffers))
            except Exception:
                pass
        return pl.BlockSpec((TN, D_pad), lambda i, j: (j, 0))

    in_specs = [
        pl.BlockSpec(memory_space=pltpu.MemorySpace.SMEM),       # logit_scale (scalar)
        pl.BlockSpec((TM, 1), lambda i, j: (i, 0)),              # labels   (row-resident)
        pl.BlockSpec((TM, C), lambda i, j: (i, 0)),              # cls logits (row-resident)
        pl.BlockSpec((TM, D_pad), lambda i, j: (i, 0)),          # main features (row-resident)
        _b_spec(),                                               # GEN features (streamed)
    ]
    out_shape = (
        jax.ShapeDtypeStruct((B_pad, 1), jnp.float32),           # per-row logsumexp
        jax.ShapeDtypeStruct((B_pad, 1), jnp.float32),           # diag(sim)
        jax.ShapeDtypeStruct((B_pad, 1), jnp.float32),           # per-row cls NLL
        jax.ShapeDtypeStruct((nR, 8, B_pad), jnp.float32),       # column partial sums
        jax.ShapeDtypeStruct((nR, 8, B_pad), jnp.float32),       # column partial refs
    )
    out_specs = (
        pl.BlockSpec((TM, 1), lambda i, j: (i, 0)),
        pl.BlockSpec((TM, 1), lambda i, j: (i, 0)),
        pl.BlockSpec((TM, 1), lambda i, j: (i, 0)),
        pl.BlockSpec((1, 8, TN), lambda i, j: (i, 0, j)),
        pl.BlockSpec((1, 8, TN), lambda i, j: (i, 0, j)),
    )
    scratch_shapes = [
        pltpu.VMEM((TM, D_pad), mxu_dtype),      # normalized+scaled row features
        pltpu.VMEM((TM, 1), jnp.float32),        # running row max
        pltpu.VMEM((TM, 1), jnp.float32),        # running row sum-exp
    ]

    # Generation-aware VMEM request: never ask for more than 75% of physical.
    try:
        vmem_cap = int(pltpu.get_tpu_info().vmem_capacity_bytes)
    except Exception:
        vmem_cap = 64 * 1024 * 1024              # conservative (v7x) fallback
    fbytes = jnp.dtype(logits_cont.dtype).itemsize
    cbytes = jnp.dtype(logits_cls.dtype).itemsize
    mbytes = jnp.dtype(mxu_dtype).itemsize
    step_bytes = (2 * TM * D_pad * fbytes + 3 * TN * D_pad * fbytes
                  + 2 * TM * C * cbytes + 2 * TM * 128 * 4
                  + 6 * TM * 128 * 4 + 4 * 2 * 8 * TN * 4
                  + TM * D_pad * mbytes
                  + 4 * (2 * TM * TN + TM * C + TM * D_pad + TN * D_pad))
    vmem_limit = int(min(0.75 * vmem_cap, max(32 * 1024 * 1024, 2 * step_bytes)))

    cost = pl.CostEstimate(
        flops=int(2 * B_pad * B_pad * D_pad + 12 * B_pad * B_pad
                  + 6 * (nR + 1) * B_pad * D_pad + 4 * B_pad * C),
        transcendentals=int(B_pad * B_pad + B_pad * C + 8 * B_pad),
        bytes_accessed=int((nR + 1) * B_pad * D_pad * fbytes
                           + B_pad * C * cbytes + 4 * B_pad * (4 + 16 * nR)),
    )

    rowlse, diag, cls_nll, colpart, colref = pl.pallas_call(
        functools.partial(_clip_loss_kernel, valid_b=B),
        out_shape=out_shape,
        grid_spec=pltpu.PrefetchScalarGridSpec(
            num_scalar_prefetch=0,
            grid=(nR, nC),
            in_specs=in_specs,
            out_specs=out_specs,
            scratch_shapes=scratch_shapes),
        compiler_params=pltpu.CompilerParams(
            dimension_semantics=("parallel", "arbitrary"),
            vmem_limit_bytes=vmem_limit),
        cost_estimate=cost,
    )(scale_2d, labels_p, cls_p, a_p, b_p)

    # ------------------- cheap O(nR*B) epilogue in plain JAX -------------------
    rowlse = rowlse[:B, 0]
    diag = diag[:B, 0]
    cls_nll = cls_nll[:B, 0]
    cp = colpart[:, 0, :B]                                   # (nR, B)
    cr = colref[:, 0, :B]                                    # (nR, B)
    g = jnp.max(cr, axis=0)                                  # (B,)
    col_lse = g + jnp.log(jnp.maximum(jnp.sum(cp * jnp.exp(cr - g), axis=0), 1e-30))

    loss_cls = jnp.mean(cls_nll)
    mean_diag = jnp.mean(diag)
    # Reference sums the two directions (no 0.5 averaging).
    loss_cont = (jnp.mean(rowlse) - mean_diag) + (jnp.mean(col_lse) - mean_diag)
    loss = loss_cls + beta * loss_cont
    return {
        "loss": loss,
        "loss_cls": loss_cls,    # .detach() is a no-op in this functional setting
        "loss_cont": loss_cont,
    }


if __name__ == "__main__":
    # Small shapes consistent with the module's forward signature.
    B, C, D = 8, 16, 32   # batch, num classes, latent dim

    key = jax.random.PRNGKey(0)
    k1, k2, k3, k4 = jax.random.split(key, 4)
    logits_cls = jax.random.normal(k1, (B, C), dtype=jnp.float32)
    labels_cls = jax.random.randint(k2, (B,), 0, C, dtype=jnp.int32)
    logits_cont = jax.random.normal(k3, (B, D), dtype=jnp.float32)
    logits_cont_gen = jax.random.normal(k4, (B, D), dtype=jnp.float32)

    # Deterministic parameter init, identical to nn.Parameter(ones([]) * log(1/0.07))
    logit_scale = jnp.float32(np.log(1.0 / 0.07))

    out = clip_loss(logits_cls, labels_cls, logits_cont, logits_cont_gen, logit_scale)
    jax.block_until_ready(out)
    print("KERNEL_OK")
</pallas_src>

<mosaic_0001>
module attributes {stable_mosaic.version = 11 : i64} {
  func.func @_clip_loss_kernel(%arg0: i32, %arg1: i32, %arg2: memref<1x1xf32, #tpu.memory_space<smem>>, %arg3: memref<8x1xi32, #tpu.memory_space<vmem>>, %arg4: memref<8x16xf32, #tpu.memory_space<vmem>>, %arg5: memref<8x128xf32, #tpu.memory_space<vmem>>, %arg6: memref<8x128xf32, #tpu.memory_space<vmem>>, %arg7: memref<8x1xf32, #tpu.memory_space<vmem>>, %arg8: memref<8x1xf32, #tpu.memory_space<vmem>>, %arg9: memref<8x1xf32, #tpu.memory_space<vmem>>, %arg10: memref<1x8x8xf32, #tpu.memory_space<vmem>>, %arg11: memref<1x8x8xf32, #tpu.memory_space<vmem>>, %arg12: memref<8x128xbf16, #tpu.memory_space<vmem>>, %arg13: memref<8x1xf32, #tpu.memory_space<vmem>>, %arg14: memref<8x1xf32, #tpu.memory_space<vmem>>) attributes {dimension_semantics = [#tpu.dimension_semantics<parallel>, #tpu.dimension_semantics<arbitrary>], iteration_bounds = array<i64: 1, 1>, scalar_prefetch = 0 : i64, scratch_operands = 3 : i64, tpu.core_type = #tpu.core_type<tc>, window_params = [{transform_indices = @transform_0, window_bounds = array<i64: 1, 1>}, {transform_indices = @transform_1, window_bounds = array<i64: 8, 1>}, {transform_indices = @transform_2, window_bounds = array<i64: 8, 16>}, {transform_indices = @transform_3, window_bounds = array<i64: 8, 128>}, {transform_indices = @transform_4, window_bounds = array<i64: 8, 128>}, {transform_indices = @transform_5, window_bounds = array<i64: 8, 1>}, {transform_indices = @transform_6, window_bounds = array<i64: 8, 1>}, {transform_indices = @transform_7, window_bounds = array<i64: 8, 1>}, {transform_indices = @transform_8, window_bounds = array<i64: 1, 8, 8>}, {transform_indices = @transform_9, window_bounds = array<i64: 1, 8, 8>}]} {
    %c8_i32 = arith.constant 8 : i32
    %0 = arith.muli %arg0, %c8_i32 : i32
    %1 = tpu.iota {dimensions = array<i32: 0>} : vector<8x1xi32>
    %2 = vector.broadcast %0 : i32 to vector<8x1xi32>
    %3 = arith.addi %2, %1 : vector<8x1xi32>
    %c8_i32_0 = arith.constant 8 : i32
    %4 = vector.broadcast %c8_i32_0 : i32 to vector<8x1xi32>
    %5 = arith.cmpi slt, %3, %4 : vector<8x1xi32>
    %c0_i32 = arith.constant 0 : i32
    %6 = arith.cmpi eq, %arg1, %c0_i32 : i32
    %7 = arith.extui %6 : i1 to i32
    %c0_i32_1 = arith.constant 0 : i32
    %8 = arith.cmpi ne, %7, %c0_i32_1 : i32
    scf.if %8 {
      %c0_33 = arith.constant 0 : index
      %c0_34 = arith.constant 0 : index
      %70 = vector.load %arg5[%c0_33, %c0_34] : memref<8x128xf32, #tpu.memory_space<vmem>>, vector<8x128xf32>
      %c0_35 = arith.constant 0 : index
      %c0_36 = arith.constant 0 : index
      %71 = memref.load %arg2[%c0_35, %c0_36] : memref<1x1xf32, #tpu.memory_space<smem>>
      %72 = math.exp %71 : f32
      %73 = arith.mulf %70, %70 : vector<8x128xf32>
      %cst_37 = arith.constant dense<0.000000e+00> : vector<8xf32>
      %74 = vector.multi_reduction <add>, %73, %cst_37 [1] : vector<8x128xf32> to vector<8xf32>
      %75 = vector.shape_cast %74 : vector<8xf32> to vector<8x1xf32>
      %cst_38 = arith.constant 1.000000e-24 : f32
      %76 = vector.broadcast %cst_38 : f32 to vector<8x1xf32>
      %77 = arith.maximumf %75, %76 : vector<8x1xf32>
      %78 = math.rsqrt %77 : vector<8x1xf32>
      %79 = vector.broadcast %72 : f32 to vector<8x1xf32>
      %80 = arith.mulf %79, %78 : vector<8x1xf32>
      %81 = vector.broadcast %80 : vector<8x1xf32> to vector<8x128xf32>
      %82 = arith.mulf %70, %81 : vector<8x128xf32>
      %83 = arith.truncf %82 : vector<8x128xf32> to vector<8x128xbf16>
      %c0_39 = arith.constant 0 : index
      %c0_40 = arith.constant 0 : index
      %84 = vector.load %arg12[%c0_39, %c0_40] : memref<8x128xbf16, #tpu.memory_space<vmem>>, vector<8x128xbf16>
      tpu.vector_store %arg12[%c0_39, %c0_40], %83 {strides = array<i32>} : memref<8x128xbf16, #tpu.memory_space<vmem>>, vector<8x128xbf16>,
      %cst_41 = arith.constant -1.000000e+30 : f32
      %85 = vector.broadcast %cst_41 : f32 to vector<8x1xf32>
      %c0_42 = arith.constant 0 : index
      %c0_43 = arith.constant 0 : index
      %86 = vector.load %arg13[%c0_42, %c0_43] : memref<8x1xf32, #tpu.memory_space<vmem>>, vector<8x1xf32>
      tpu.vector_store %arg13[%c0_42, %c0_43], %85 {strides = array<i32>} : memref<8x1xf32, #tpu.memory_space<vmem>>, vector<8x1xf32>,
      %cst_44 = arith.constant 0.000000e+00 : f32
      %87 = vector.broadcast %cst_44 : f32 to vector<8x1xf32>
      %c0_45 = arith.constant 0 : index
      %c0_46 = arith.constant 0 : index
      %88 = vector.load %arg14[%c0_45, %c0_46] : memref<8x1xf32, #tpu.memory_space<vmem>>, vector<8x1xf32>
      tpu.vector_store %arg14[%c0_45, %c0_46], %87 {strides = array<i32>} : memref<8x1xf32, #tpu.memory_space<vmem>>, vector<8x1xf32>,
      %cst_47 = arith.constant 0.000000e+00 : f32
      %89 = vector.broadcast %cst_47 : f32 to vector<8x1xf32>
      %c0_48 = arith.constant 0 : index
      %c0_49 = arith.constant 0 : index
      %90 = vector.load %arg8[%c0_48, %c0_49] : memref<8x1xf32, #tpu.memory_space<vmem>>, vector<8x1xf32>
      tpu.vector_store %arg8[%c0_48, %c0_49], %89 {strides = array<i32>} : memref<8x1xf32, #tpu.memory_space<vmem>>, vector<8x1xf32>,
      %c0_50 = arith.constant 0 : index
      %c0_51 = arith.constant 0 : index
      %91 = vector.load %arg4[%c0_50, %c0_51] : memref<8x16xf32, #tpu.memory_space<vmem>>, vector<8x16xf32>
      %cst_52 = arith.constant dense<0xFF800000> : vector<8xf32>
      %92 = vector.multi_reduction <maximumf>, %91, %cst_52 [1] : vector<8x16xf32> to vector<8xf32>
      %93 = vector.shape_cast %92 : vector<8xf32> to vector<8x1xf32>
      %94 = vector.broadcast %93 : vector<8x1xf32> to vector<8x16xf32>
      %95 = arith.subf %91, %94 : vector<8x16xf32>
      %96 = math.exp %95 : vector<8x16xf32>
      %cst_53 = arith.constant dense<0.000000e+00> : vector<8xf32>
      %97 = vector.multi_reduction <add>, %96, %cst_53 [1] : vector<8x16xf32> to vector<8xf32>
      %98 = vector.shape_cast %97 : vector<8xf32> to vector<8x1xf32>
      %99 = math.log %98 : vector<8x1xf32>
      %100 = arith.addf %93, %99 : vector<8x1xf32>
      %101 = tpu.iota {dimensions = array<i32: 1>} : vector<8x16xi32>
      %c0_54 = arith.constant 0 : index
      %c0_55 = arith.constant 0 : index
      %102 = vector.load %arg3[%c0_54, %c0_55] : memref<8x1xi32, #tpu.memory_space<vmem>>, vector<8x1xi32>
      %103 = vector.broadcast %102 : vector<8x1xi32> to vector<8x16xi32>
      %104 = arith.cmpi eq, %101, %103 : vector<8x16xi32>
      %cst_56 = arith.constant 0.000000e+00 : f32
      %105 = vector.broadcast %cst_56 : f32 to vector<8x16xf32>
      %106 = arith.select %104, %91, %105 : vector<8x16xi1>, vector<8x16xf32>
      %cst_57 = arith.constant dense<0.000000e+00> : vector<8xf32>
      %107 = vector.multi_reduction <add>, %106, %cst_57 [1] : vector<8x16xf32> to vector<8xf32>
      %108 = vector.shape_cast %107 : vector<8xf32> to vector<8x1xf32>
      %109 = arith.subf %100, %108 : vector<8x1xf32>
      %c0_58 = arith.constant 0 : index
      %c0_59 = arith.constant 0 : index
      %110 = vector.load %arg9[%c0_58, %c0_59] : memref<8x1xf32, #tpu.memory_space<vmem>>, vector<8x1xf32>
      tpu.vector_store %arg9[%c0_58, %c0_59], %109 {strides = array<i32>} : memref<8x1xf32, #tpu.memory_space<vmem>>, vector<8x1xf32>,
    } else {
    }
    %c0 = arith.constant 0 : index
    %c0_2 = arith.constant 0 : index
    %9 = vector.load %arg6[%c0, %c0_2] : memref<8x128xf32, #tpu.memory_space<vmem>>, vector<8x128xf32>
    %10 = arith.mulf %9, %9 : vector<8x128xf32>
    %cst = arith.constant dense<0.000000e+00> : vector<8xf32>
    %11 = vector.multi_reduction <add>, %10, %cst [1] : vector<8x128xf32> to vector<8xf32>
    %12 = vector.shape_cast %11 : vector<8xf32> to vector<8x1xf32>
    %cst_3 = arith.constant 1.000000e-24 : f32
    %13 = vector.broadcast %cst_3 : f32 to vector<8x1xf32>
    %14 = arith.maximumf %12, %13 : vector<8x1xf32>
    %15 = math.rsqrt %14 : vector<8x1xf32>
    %16 = vector.broadcast %15 : vector<8x1xf32> to vector<8x128xf32>
    %17 = arith.mulf %9, %16 : vector<8x128xf32>
    %18 = arith.truncf %17 : vector<8x128xf32> to vector<8x128xbf16>
    %c0_4 = arith.constant 0 : index
    %c0_5 = arith.constant 0 : index
    %19 = vector.load %arg12[%c0_4, %c0_5] : memref<8x128xbf16, #tpu.memory_space<vmem>>, vector<8x128xbf16>
    %cst_6 = arith.constant dense<0.000000e+00> : vector<8x8xf32>
    %20 = tpu.matmul %19, %18, %cst_6 {dimension_numbers = #tpu.dot_dimension_numbers<[1], [1], [0], [0], [0, 0, 1, 0], [], []>} : vector<8x128xbf16>, vector<8x128xbf16>, vector<8x8xf32> -> vector<8x8xf32>
    %c8_i32_7 = arith.constant 8 : i32
    %21 = arith.muli %arg1, %c8_i32_7 : i32
    %22 = tpu.iota {dimensions = array<i32: 1>} : vector<8x8xi32>
    %23 = vector.broadcast %21 : i32 to vector<8x8xi32>
    %24 = arith.addi %23, %22 : vector<8x8xi32>
    %c8_i32_8 = arith.constant 8 : i32
    %25 = vector.broadcast %c8_i32_8 : i32 to vector<8x8xi32>
    %26 = arith.cmpi slt, %24, %25 : vector<8x8xi32>
    %cst_9 = arith.constant -1.000000e+30 : f32
    %27 = vector.broadcast %cst_9 : f32 to vector<8x8xf32>
    %28 = arith.select %26, %20, %27 : vector<8x8xi1>, vector<8x8xf32>
    %29 = arith.cmpi eq, %arg1, %arg0 : i32
    %30 = arith.extui %29 : i1 to i32
    %c0_i32_10 = arith.constant 0 : i32
    %31 = arith.cmpi ne, %30, %c0_i32_10 : i32
    scf.if %31 {
      %70 = vector.broadcast %3 : vector<8x1xi32> to vector<8x8xi32>
      %71 = arith.cmpi eq, %24, %70 : vector<8x8xi32>
      %72 = arith.andi %71, %26 : vector<8x8xi1>
      %cst_33 = arith.constant 0.000000e+00 : f32
      %73 = vector.broadcast %cst_33 : f32 to vector<8x8xf32>
      %74 = arith.select %72, %28, %73 : vector<8x8xi1>, vector<8x8xf32>
      %cst_34 = arith.constant dense<0.000000e+00> : vector<8xf32>
      %75 = vector.multi_reduction <add>, %74, %cst_34 [1] : vector<8x8xf32> to vector<8xf32>
      %76 = vector.shape_cast %75 : vector<8xf32> to vector<8x1xf32>
      %c0_35 = arith.constant 0 : index
      %c0_36 = arith.constant 0 : index
      %77 = vector.load %arg8[%c0_35, %c0_36] : memref<8x1xf32, #tpu.memory_space<vmem>>, vector<8x1xf32>
      tpu.vector_store %arg8[%c0_35, %c0_36], %76 {strides = array<i32>} : memref<8x1xf32, #tpu.memory_space<vmem>>, vector<8x1xf32>,
    } else {
    }
    %c0_11 = arith.constant 0 : index
    %c0_12 = arith.constant 0 : index
    %32 = vector.load %arg13[%c0_11, %c0_12] : memref<8x1xf32, #tpu.memory_space<vmem>>, vector<8x1xf32>
    %cst_13 = arith.constant dense<0xFF800000> : vector<8xf32>
    %33 = vector.multi_reduction <maximumf>, %28, %cst_13 [1] : vector<8x8xf32> to vector<8xf32>
    %34 = vector.shape_cast %33 : vector<8xf32> to vector<8x1xf32>
    %35 = arith.maximumf %32, %34 : vector<8x1xf32>
    %36 = vector.broadcast %35 : vector<8x1xf32> to vector<8x8xf32>
    %37 = arith.subf %28, %36 : vector<8x8xf32>
    %38 = math.exp %37 : vector<8x8xf32>
    %39 = arith.subf %32, %35 : vector<8x1xf32>
    %40 = math.exp %39 : vector<8x1xf32>
    %c0_14 = arith.constant 0 : index
    %c0_15 = arith.constant 0 : index
    %41 = vector.load %arg14[%c0_14, %c0_15] : memref<8x1xf32, #tpu.memory_space<vmem>>, vector<8x1xf32>
    %42 = arith.mulf %40, %41 : vector<8x1xf32>
    %cst_16 = arith.constant dense<0.000000e+00> : vector<8xf32>
    %43 = vector.multi_reduction <add>, %38, %cst_16 [1] : vector<8x8xf32> to vector<8xf32>
    %44 = vector.shape_cast %43 : vector<8xf32> to vector<8x1xf32>
    %45 = arith.addf %42, %44 : vector<8x1xf32>
    %c0_17 = arith.constant 0 : index
    %c0_18 = arith.constant 0 : index
    %46 = vector.load %arg13[%c0_17, %c0_18] : memref<8x1xf32, #tpu.memory_space<vmem>>, vector<8x1xf32>
    tpu.vector_store %arg13[%c0_17, %c0_18], %35 {strides = array<i32>} : memref<8x1xf32, #tpu.memory_space<vmem>>, vector<8x1xf32>,
    %c0_19 = arith.constant 0 : index
    %c0_20 = arith.constant 0 : index
    %47 = vector.load %arg14[%c0_19, %c0_20] : memref<8x1xf32, #tpu.memory_space<vmem>>, vector<8x1xf32>
    tpu.vector_store %arg14[%c0_19, %c0_20], %45 {strides = array<i32>} : memref<8x1xf32, #tpu.memory_space<vmem>>, vector<8x1xf32>,
    %48 = math.log %45 : vector<8x1xf32>
    %49 = arith.addf %35, %48 : vector<8x1xf32>
    %c0_21 = arith.constant 0 : index
    %c0_22 = arith.constant 0 : index
    %50 = vector.load %arg7[%c0_21, %c0_22] : memref<8x1xf32, #tpu.memory_space<vmem>>, vector<8x1xf32>
    tpu.vector_store %arg7[%c0_21, %c0_22], %49 {strides = array<i32>} : memref<8x1xf32, #tpu.memory_space<vmem>>, vector<8x1xf32>,
    %cst_23 = arith.constant -1.000000e+30 : f32
    %51 = vector.broadcast %cst_23 : f32 to vector<8x1xf32>
    %52 = arith.select %5, %35, %51 : vector<8x1xi1>, vector<8x1xf32>
    %53 = vector.shape_cast %52 : vector<8x1xf32> to vector<1x8x1xf32>
    %cst_24 = arith.constant dense<0xFF800000> : vector<1xf32>
    %54 = vector.multi_reduction <maximumf>, %53, %cst_24 [1, 2] : vector<1x8x1xf32> to vector<1xf32>
    %55 = vector.shape_cast %54 : vector<1xf32> to vector<1x1x1xf32>
    %56 = vector.extract %55[0, 0, 0] : f32 from vector<1x1x1xf32>
    %57 = vector.broadcast %56 : f32 to vector<8x1xf32>
    %58 = arith.subf %35, %57 : vector<8x1xf32>
    %59 = math.exp %58 : vector<8x1xf32>
    %cst_25 = arith.constant 0.000000e+00 : f32
    %60 = vector.broadcast %cst_25 : f32 to vector<8x1xf32>
    %61 = arith.select %5, %59, %60 : vector<8x1xi1>, vector<8x1xf32>
    %62 = vector.broadcast %61 : vector<8x1xf32> to vector<8x8xf32>
    %63 = arith.mulf %38, %62 : vector<8x8xf32>
    %cst_26 = arith.constant dense<0.000000e+00> : vector<8xf32>
    %64 = vector.multi_reduction <add>, %63, %cst_26 [0] : vector<8x8xf32> to vector<8xf32>
    %65 = vector.shape_cast %64 : vector<8xf32> to vector<1x1x8xf32>
    %66 = vector.broadcast %65 : vector<1x1x8xf32> to vector<1x8x8xf32>
    %c0_27 = arith.constant 0 : index
    %c0_28 = arith.constant 0 : index
    %c0_29 = arith.constant 0 : index
    %67 = vector.load %arg10[%c0_27, %c0_28, %c0_29] : memref<1x8x8xf32, #tpu.memory_space<vmem>>, vector<1x8x8xf32>
    tpu.vector_store %arg10[%c0_27, %c0_28, %c0_29], %66 {strides = array<i32>} : memref<1x8x8xf32, #tpu.memory_space<vmem>>, vector<1x8x8xf32>,
    %68 = vector.broadcast %56 : f32 to vector<1x8x8xf32>
    %c0_30 = arith.constant 0 : index
    %c0_31 = arith.constant 0 : index
    %c0_32 = arith.constant 0 : index
    %69 = vector.load %arg11[%c0_30, %c0_31, %c0_32] : memref<1x8x8xf32, #tpu.memory_space<vmem>>, vector<1x8x8xf32>
    tpu.vector_store %arg11[%c0_30, %c0_31, %c0_32], %68 {strides = array<i32>} : memref<1x8x8xf32, #tpu.memory_space<vmem>>, vector<1x8x8xf32>,
    return
  }
  func.func @transform_0(%arg0: i32, %arg1: i32) -> (i32, i32) {
    %c0_i32 = arith.constant 0 : i32
    %c0_i32_0 = arith.constant 0 : i32
    %c0_i32_1 = arith.constant 0 : i32
    return %c0_i32, %c0_i32_0 : i32, i32
  }
  func.func @transform_1(%arg0: i32, %arg1: i32) -> (i32, i32) {
    %c0_i32 = arith.constant 0 : i32
    %c0_i32_0 = arith.constant 0 : i32
    return %arg0, %c0_i32 : i32, i32
  }
  func.func @transform_2(%arg0: i32, %arg1: i32) -> (i32, i32) {
    %c0_i32 = arith.constant 0 : i32
    %c0_i32_0 = arith.constant 0 : i32
    return %arg0, %c0_i32 : i32, i32
  }
  func.func @transform_3(%arg0: i32, %arg1: i32) -> (i32, i32) {
    %c0_i32 = arith.constant 0 : i32
    %c0_i32_0 = arith.constant 0 : i32
    return %arg0, %c0_i32 : i32, i32
  }
  func.func @transform_4(%arg0: i32, %arg1: i32) -> (i32, i32) {
    %c0_i32 = arith.constant 0 : i32
    %c0_i32_0 = arith.constant 0 : i32
    return %arg1, %c0_i32 : i32, i32
  }
  func.func @transform_5(%arg0: i32, %arg1: i32) -> (i32, i32) {
    %c0_i32 = arith.constant 0 : i32
    %c0_i32_0 = arith.constant 0 : i32
    return %arg0, %c0_i32 : i32, i32
  }
  func.func @transform_6(%arg0: i32, %arg1: i32) -> (i32, i32) {
    %c0_i32 = arith.constant 0 : i32
    %c0_i32_0 = arith.constant 0 : i32
    return %arg0, %c0_i32 : i32, i32
  }
  func.func @transform_7(%arg0: i32, %arg1: i32) -> (i32, i32) {
    %c0_i32 = arith.constant 0 : i32
    %c0_i32_0 = arith.constant 0 : i32
    return %arg0, %c0_i32 : i32, i32
  }
  func.func @transform_8(%arg0: i32, %arg1: i32) -> (i32, i32, i32) {
    %c0_i32 = arith.constant 0 : i32
    %c0_i32_0 = arith.constant 0 : i32
    return %arg0, %c0_i32, %arg1 : i32, i32, i32
  }
  func.func @transform_9(%arg0: i32, %arg1: i32) -> (i32, i32, i32) {
    %c0_i32 = arith.constant 0 : i32
    %c0_i32_0 = arith.constant 0 : i32
    return %arg0, %c0_i32, %arg1 : i32, i32, i32
  }
}

</mosaic_0001>

<bundles_post_ra>
// kernel: tpu_custom_call.1
= control target key start
LH: loop header
LB: loop body
LE: loop exit
PB: predicated region body
PF: predicated region fallthrough
CT: control target
= control target key end

     0   :  { %16 = vsyncpa [#allocation7], 0  ;;  %s501_s0 = inlined_call_operand.<no memory space> [shape: f32[1,1], index: 0, kind: input, shape index: {}]   ;;  %s502_s1 = inlined_call_operand.vmem [shape: s32[8,1], index: 1, kind: input, shape index: {}]   ;;  %s503_s2 = inlined_call_operand.vmem [shape: f32[8,16], index: 2, kind: input, shape index: {}]   ;;  %s504_s3 = inlined_call_operand.hbm [shape: f32[8,128], index: 3, kind: input, shape index: {}]   ;;  %s505_s4 = inlined_call_operand.vmem [shape: f32[8,128], index: 4, kind: input, shape index: {}]   ;;  %s506_s5 = inlined_call_operand.vmem [shape: f32[8,1], index: 5, kind: output, shape index: {0}]   ;;  %s507_s6 = inlined_call_operand.vmem [shape: f32[8,1], index: 6, kind: output, shape index: {1}]   ;;  %s508_s7 = inlined_call_operand.vmem [shape: f32[8,1], index: 7, kind: output, shape index: {2}]   ;;  %s509_s8 = inlined_call_operand.hbm [shape: f32[1,8,8], index: 8, kind: output, shape index: {3}]   ;;  %s510_s9 = inlined_call_operand.hbm [shape: f32[1,8,8], index: 9, kind: output, shape index: {4}]  }
   0x1   :  { %17 = vsyncpa [#allocation8], 0 }
   0x2   :  { %18 = vsyncpa [#allocation11], 0  ;;  %s374_s30 = smov [#allocation6]  }
   0x3   :  { %s31_s10 = sshll.u32 %s374_s30, 4  ;;  %s32_s10 = int_to_ptr.vmem [resolvable:$true] %s31_s10 }
   0x4   :  { %s316_s11 = scalar_lea.vmem %s32_s10, 128  ;;  %p321_p1 = scmp.lt.s32.totalorder %s32_s10, %s32_s10 }
   0x5   :  { %p317_p0 = scmp.ne.s32.totalorder %s32_s10, %s316_s11  ;;  %p322_p2 = scmp.lt.s32.totalorder %s316_s11, %s316_s11 }
   0x7   :  { %p323_p3 = por %p322_p2, %p321_p1 }
   0x9   :  { %p324_p4 = pnand %p323_p3, %p317_p0 }
   0xb   :  { %327 = shalt.err (!%p324_p4)
}
   0xc   :  { %34 = dma.hbm_to_vmem [thread:$0]  %s504_s3, 128, %s32_s10, [#allocation7]  }
   0xd   :  { %368 = dma.done.wait [#allocation7], 128  }
   0xe   :  { %369 = vsyncadd [#allocation7], 4294967168  ;;  %v53_v0 = vstv %s501_s0  ;;  %v51_v2 = vld [vmem:[#allocation6] sm:$0xff]  ;;  %v98_v3 = vld [vmem:[%s505_s4] sm:$0xff]  ;;  %vm67_vm0 = vcmask 7168   ;;  %v375_v7 = vmov 0.0   ;;  %v42_v24 = vlaneseq }
   0xf   :  { %v54_v1 = vmul.f32 1.442695, %v53_v0  ;;  %v57_v4 = vmul.f32 %v51_v2, %v51_v2  ;;  %v99_v5 = vmul.f32 %v98_v3, %v98_v3  ;;  %69 = vst.msk [vmem:[#allocation4] sm:$0xff] %vm67_vm0, %v375_v7  ;;  %271 = vmatprep.subr.bf16.mxu0 %v375_v7  ;;  %70 = vst.msk [vmem:[%s507_s6] sm:$0xff] %vm67_vm0, %v375_v7  ;;  %vm376_vm1 = vmmov 0   ;;  %v448_v21 = vld [vmem:[%s503_s2] sm:$0xff] }
  0x10   :  { %273 = vmatprep.mubr.msk.bf16.mxu0 %vm376_vm1, %v375_v7  ;;  %vm72_vm2 = vcmask 130048   ;;  %v377_v23 = vmov -1e+30   ;;  %v86_v25 = vand.u32 127, %v42_v24  ;;  %vm161_vm4 = vcmask 64512   ;;  %v87_v33 = vld [vmem:[%s502_s1] sm:$0xff] }
  0x11   :  { %290 = vpow2.f32 %v54_v1  ;;  %58 = vadd.xlane.f32.xlu0 %v57_v4  ;;  %v73_v22 = vsel %vm72_vm2, %v448_v21, -inf  ;;  %68 = vst.msk [vmem:[#allocation3] sm:$0xff] %vm67_vm0, %v377_v23  ;;  %v378_v32 = vmov 0   ;;  %v43_v53 = vshrl.u32 %v42_v24, 7  ;;  %s379_s21 = smov [#allocation10]  }
  0x12   :  { %vm152_vm3 = vcmp.lt.s32.totalorder %v86_v25, 8  ;;  %288 = vset.pattern.permute.xlu1 %v378_v32  ;;  %289 = vset.pattern.permute.xlu0 %v378_v32  ;;  %s250_s22 = sshll.u32 %s379_s21, 4  ;;  %s251_s22 = int_to_ptr.vmem [resolvable:$true] %s250_s22 }
  0x13   :  { %vm158_vm5 = vcmp.eq.s32.totalorder %v86_v25, %v43_v53  ;;  %s328_s23 = scalar_lea.vmem %s251_s22, 128  ;;  %p333_p6 = scmp.lt.s32.totalorder %s251_s22, %s251_s22 }
  0x14   :  { %vm159_vm6 = vmand %vm158_vm5, %vm152_vm3  ;;  %p329_p5 = scmp.ne.s32.totalorder %s251_s22, %s328_s23  ;;  %p334_p7 = scmp.lt.s32.totalorder %s328_s23, %s328_s23 }
  0x15   :  { %100 = vadd.xlane.f32.xlu0 %v99_v5 }
  0x16   :  { %p335_p8 = por %p334_p7, %p333_p6 }
  0x18   :  { %v167_v34 = vld [vmem:[#allocation3] sm:$0xff]  ;;  %p336_p9 = pnand %p335_p8, %p329_p5 }
  0x19   :  { %74 = vmax.xlane.f32.xlu0 %v73_v22 }
  0x1e   :  { %v291_v6 = vpop.eup %290 }
  0x1f   :  { %277 = vpush %v291_v6 }
  0x2f   :  { %89 = vperm.xlu0 %289, %v87_v33  }
  0x50   :  { %s278_s4 = spop %277 }
  0x51   :  { %v62_v12 = vstv %s278_s4 }
  0x9a   :  { %v59_v8 = vpop.xlane.xlu0 %58 }
  0x9b   :  { %v60_v9 = vmax.f32 %v59_v8, 1e-24 }
  0x9d   :  { %292 = vrsqrt.f32 %v60_v9 }
  0x9e   :  { %v101_v10 = vpop.xlane.xlu0 %100 }
  0x9f   :  { %v102_v11 = vmax.f32 %v101_v10, 1e-24 }
  0xa1   :  { %294 = vrsqrt.f32 %v102_v11 }
  0xa2   :  { %v465_v38 = vpop.xlane.xlu0 %74 }
  0xa3   :  { %v76_v39 = vsub.f32 %v448_v21, %v465_v38 }
  0xa5   :  { %v77_v40 = vmul.f32 1.442695, %v76_v39 }
  0xa7   :  { %296 = vpow2.f32 %v77_v40 }
  0xaa   :  { %v293_v13 = vpop.eup %292  ;;  %v90_v62 = vpop.permute.xlu0 %89 }
  0xab   :  { %v63_v14 = vmul.f32 %v293_v13, %v62_v12  ;;  %vm91_vm7 = vcmp.eq.s32.totalorder %v86_v25, %v90_v62 }
  0xac   :  { %v92_v63 = vsel %vm91_vm7, %v448_v21, 0.0 }
  0xad   :  { %v64_v15 = vmul.f32 %v63_v14, %v51_v2  ;;  %v93_v0 = vsel %vm72_vm2, %v92_v63, 0.0 }
  0xae   :  { %v295_v16 = vpop.eup %294 }
  0xaf   :  { %v65_v17 = vpack.c.bf16 %v64_v15, %v64_v15  ;;  %v104_v18 = vmul.f32 %v295_v16, %v98_v3 }
  0xb1   :  { %66 = vst [vmem:[#allocation2] sm:$0xf] %v65_v17  ;;  %v105_v19 = vpack.c.bf16 %v104_v18, %v104_v18 }
  0xb3   :  { %272 = vmatpush3.bf16.xpose.msra.mxu0 %v105_v19 }
  0xb4   :  { %v297_v41 = vpop.eup %296 }
  0xb5   :  { %v79_v42 = vsel %vm72_vm2, %v297_v41, 0.0 }
  0xb8   :  { %v106_v20 = vld [vmem:[#allocation2] sm:$0xf] }
  0xba   :  { %274 = vmatmul.mubr.bf16.vlgmr.msra.gmra.mxu0 %v106_v20 }
 0x17a   :  { %v141_v26 = vpop.f32.mrf.mxu0 }
 0x17b   :  { %v153_v27 = vsel %vm152_vm3, %v141_v26, -1e+30 }
 0x17c   :  { %v275_v28 = vpop.f32.mrf.mxu0  ;;  %v169_v29 = vsel %vm161_vm4, %v153_v27, -inf  ;;  %v160_v56 = vsel %vm159_vm6, %v153_v27, 0.0 }
 0x17d   :  { %170 = vmax.xlane.f32.xlu1 %v169_v29  ;;  %v162_v57 = vsel %vm161_vm4, %v160_v56, 0.0 }
 0x17e   :  { %v144_v30 = vpop.f32.mrf.mxu0 }
 0x180   :  { %v276_v31 = vpop.f32.mrf.mxu0 }
 0x206   :  { %v171_v35 = vpop.xlane.xlu1 %170 }
 0x207   :  { %v458_v36 = vmax.f32 %v167_v34, %v171_v35 }
 0x209   :  { %191 = vst.msk [vmem:[#allocation3] sm:$0xff] %vm67_vm0, %v458_v36  ;;  %v198_v37 = vsel %vm67_vm0, %v458_v36, -inf }
 0x20a   :  { %199 = vmax.xlane.f32.xlu1 %v198_v37 }
 0x21b   :  { %175 = vperm.xlu1 %288, %v458_v36  }
 0x23f   :  { %80 = vadd.xlane.f32.xlu1 %v79_v42 }
 0x293   :  { %v200_v43 = vpop.xlane.xlu1 %199 }
 0x294   :  { %v201_v44 = vrot.slane %v200_v43, 4 }
 0x296   :  { %v202_v45 = vmax.f32 %v200_v43, %v201_v44 }
 0x297   :  { %v176_v46 = vpop.permute.xlu1 %175 }
 0x298   :  { %v203_v47 = vrot.slane %v202_v45, 2  ;;  %v178_v48 = vsub.f32 %v153_v27, %v176_v46 }
 0x29a   :  { %v179_v49 = vmul.f32 1.442695, %v178_v48  ;;  %v204_v50 = vmax.f32 %v202_v45, %v203_v47 }
 0x29c   :  { %298 = vpow2.f32 %v179_v49  ;;  %v205_v51 = vrot.slane %v204_v50, 1 }
 0x29e   :  { %v206_v52 = vmax.f32 %v204_v50, %v205_v51 }
 0x2a0   :  { %279 = vpush %v206_v52 }
 0x2a9   :  { %v299_v54 = vpop.eup %298 }
 0x2aa   :  { %v186_v55 = vsel %vm161_vm4, %v299_v54, 0.0 }
 0x2ab   :  { %187 = vadd.xlane.f32.xlu0 %v186_v55 }
 0x2af   :  { %163 = vadd.xlane.f32.xlu0 %v162_v57 }
 0x2d1   :  { %s280_s1 = spop %279 }
 0x2d2   :  { %v208_v58 = vstv %s280_s1 }
 0x2d3   :  { %v209_v59 = vsub.f32 %v458_v36, %v208_v58  ;;  %227 = vst.msk [vmem:[#allocation10] sm:$0xff] %vm161_vm4, %v208_v58 }
 0x2d5   :  { %v210_v60 = vmul.f32 1.442695, %v209_v59 }
 0x2d7   :  { %300 = vpow2.f32 %v210_v60 }
 0x2e4   :  { %v301_v61 = vpop.eup %300 }
 0x2e5   :  { %215 = vperm.xlu1 %288, %v301_v61  }
 0x309   :  { %94 = vadd.xlane.f32.xlu1 %v93_v0 }
 0x30a   :  { %339 = shalt.err (!%p336_p9)
}
 0x30b   :  { %253 = dma.vmem_to_hbm [thread:$0]  %s251_s22, 128, %s510_s9, [#allocation11]   ;;  %v181_v1 = vsub.f32 %v167_v34, %v458_v36  ;;  %v184_v4 = vld [vmem:[#allocation4] sm:$0xff]  ;;  %v81_v12 = vpop.xlane.xlu1 %80 }
 0x30c   :  { %s380_s29 = smov [#allocation9]  }
 0x30d   :  { %v182_v2 = vmul.f32 1.442695, %v181_v1 }
 0x30f   :  { %302 = vpow2.f32 %v182_v2 }
 0x31c   :  { %v303_v3 = vpop.eup %302 }
 0x31d   :  { %v185_v5 = vmul.f32 %v303_v3, %v184_v4 }
 0x334   :  { %v188_v6 = vpop.xlane.xlu0 %187 }
 0x335   :  { %v189_v7 = vadd.f32 %v188_v6, %v185_v5 }
 0x337   :  { %192 = vst.msk [vmem:[#allocation4] sm:$0xff] %vm67_vm0, %v189_v7  ;;  %304 = vlog2.f32 %v189_v7 }
 0x338   :  { %v164_v8 = vpop.xlane.xlu0 %163 }
 0x339   :  { %166 = vst.msk [vmem:[%s507_s6] sm:$0xff] %vm67_vm0, %v164_v8  ;;  %s240_s6 = sshll.u32 %s380_s29, 4  ;;  %s241_s6 = int_to_ptr.vmem [resolvable:$true] %s240_s6 }
 0x33a   :  { %s348_s30 = scalar_lea.vmem %s241_s6, 128  ;;  %p353_p11 = scmp.lt.s32.totalorder %s241_s6, %s241_s6 }
 0x33b   :  { %p349_p10 = scmp.ne.s32.totalorder %s241_s6, %s348_s30  ;;  %p354_p12 = scmp.lt.s32.totalorder %s348_s30, %s348_s30 }
 0x33d   :  { %p355_p13 = por %p354_p12, %p353_p11 }
 0x33f   :  { %p356_p0 = pnand %p355_p13, %p349_p10 }
 0x344   :  { %v305_v9 = vpop.eup %304 }
 0x345   :  { %v194_v10 = vmul.f32 0.6931472, %v305_v9 }
 0x347   :  { %v195_v11 = vadd.f32 %v194_v10, %v458_v36 }
 0x349   :  { %196 = vst.msk [vmem:[%s506_s5] sm:$0xff] %vm67_vm0, %v195_v11 }
 0x360   :  { %v216_v13 = vpop.permute.xlu1 %215 }
 0x361   :  { %v218_v14 = vmul.f32 %v299_v54, %v216_v13 }
 0x363   :  { %v219_v15 = vsel %vm161_vm4, %v218_v14, 0.0 }
 0x364   :  { %v220_v16 = vrot.slane %v219_v15, 4 }
 0x366   :  { %v221_v17 = vadd.f32 %v220_v16, %v219_v15 }
 0x368   :  { %v222_v18 = vrot.slane %v221_v17, 2 }
 0x36a   :  { %v223_v19 = vadd.f32 %v222_v18, %v221_v17 }
 0x36c   :  { %v224_v20 = vrot.slane %v223_v19, 1 }
 0x36e   :  { %v225_v21 = vadd.f32 %v224_v20, %v223_v19 }
 0x370   :  { %226 = vst.msk [vmem:[#allocation9] sm:$0xff] %vm161_vm4, %v225_v21 }
 0x371   :  { %359 = shalt.err (!%p356_p0)
}
 0x372   :  { %243 = dma.vmem_to_hbm [thread:$0]  %s241_s6, 128, %s509_s8, [#allocation8]   ;;  %306 = vlog2.f32 %v81_v12 }
 0x37f   :  { %v307_v22 = vpop.eup %306 }
 0x380   :  { %v83_v23 = vmul.f32 0.6931472, %v307_v22 }
 0x382   :  { %v84_v24 = vadd.f32 %v83_v23, %v465_v38 }
 0x392   :  { %v95_v25 = vpop.xlane.xlu1 %94 }
 0x393   :  { %v96_v26 = vsub.f32 %v84_v24, %v95_v25 }
 0x395   :  { %97 = vst.msk [vmem:[%s508_s7] sm:$0xff] %vm67_vm0, %v96_v26 }
 0x396   :  { %370 = dma.done.wait [#allocation8], 128  }
 0x397   :  { %371 = vsyncadd [#allocation8], 4294967168 }
 0x398   :  { %372 = dma.done.wait [#allocation11], 128  }
 0x399   :  { %373 = vsyncadd [#allocation11], 4294967168 }
 0x39a   :  { %266 = vsyncpa [#allocation7], 1 }
 0x39b   :  { %267 = vsyncpa [#allocation8], 1 }
 0x39c   :  { %268 = vsyncpa [#allocation11], 1 }

</bundles_post_ra>
